<compile_context>
chip_gen: v7x
topology: tpu7x:2x2x1
jax: 0.10.0
libtpu: 0.0.40
codegen_flags: <defaults>
</compile_context>

<pallas_src>
import functools

import numpy as np
import jax
import jax.numpy as jnp
from jax.experimental import pallas as pl
from jax.experimental.pallas import tpu as pltpu


def _pool_matrix(n_out, n_in):
    """P[i, r] = 1 if input row r lies in output row i's window {2i-1, 2i} (pad=1, stride=2)."""
    i = np.arange(n_out)[:, None]
    r = np.arange(n_in)[None, :]
    return ((r == 2 * i - 1) | (r == 2 * i)).astype(np.float32)


def _pick_channel_block(bc, hw, howo, in_bytes, out_bytes,
                        budget_bytes=16 * 2**20, max_tc=1024):
    """Largest sublane-aligned channel tile that fits the VMEM budget, preferring >=2 grid steps."""
    def need(tc):
        return (2 * tc * hw * in_bytes          # double-buffered input blocks
                + 2 * hw * howo * 2             # bf16 selector (conservatively counted twice)
                + 2 * tc * howo * out_bytes     # double-buffered output blocks
                + tc * hw * (4 + 2)             # f32 + bf16 copies of x**p inside the kernel
                + tc * howo * 4)                # f32 matmul accumulator

    cands = [d for d in range(8, bc + 1, 8) if bc % d == 0]
    if not cands:
        return bc                               # no sublane-aligned divisor: use the whole axis
    multi = [d for d in cands if bc // d >= 2]  # >= 2 grid steps => both v7x TensorCores busy
    pool = multi or cands
    fits = [d for d in pool if d <= max_tc and need(d) <= budget_bytes]
    return max(fits) if fits else min(pool)


def _gem_spatial_kernel(p_ref, x_ref, m_ref, o_ref, *, eps):
    p = p_ref[0]                                     # learnable exponent, f32 scalar in SMEM
    inv_p = 1.0 / p                                  # scalar reciprocal (off the vector path)
    x = x_ref[...].astype(jnp.float32)               # (tc, H*W), spatial on lanes
    # clamp(min=eps) ** p ; x > 0 after the clamp so log is safe.  Elementwise kept in f32.
    v = jnp.exp(jnp.log(jnp.maximum(x, eps)) * p)
    # 2x2 / stride-2 / pad-1 average pool as ONE MXU matmul with bf16 operands + f32 accumulation.
    # The constant selector m (bf16, entries 0 / 0.25) already contains the 1/4 divisor.
    s = jnp.dot(v.astype(jnp.bfloat16), m_ref[...],
                preferred_element_type=jnp.float32)   # (tc, Ho*Wo)
    # ** (1/p) : every pooling window contains >= 1 real element, so s >= eps**p / 4 > 0.
    o_ref[...] = jnp.exp(jnp.log(s) * inv_p).astype(o_ref.dtype)


def gem_spatial(x, p, eps=1e-6, *, block_c=None):
    """Pallas TPU forward of the GeM_Spatial module (NCHW in, NCHW out)."""
    B, C, H, W = x.shape
    Ho = (H + 2 - 2) // 2 + 1          # avg_pool2d output size, padding=1, kernel=stride=2
    Wo = (W + 2 - 2) // 2 + 1
    HW, HoWo = H * W, Ho * Wo
    BC = B * C

    # Constant pooling operator (host-side numpy): (H*W, Ho*Wo), includes the 1/4 factor.
    # 0 and 0.25 are exactly representable in bf16.
    m_np = (0.25 * np.kron(_pool_matrix(Ho, H), _pool_matrix(Wo, W)).T).astype(np.float32)
    m = jnp.asarray(m_np, dtype=jnp.bfloat16)

    in_bytes = jnp.dtype(x.dtype).itemsize
    if block_c is None:
        tc = _pick_channel_block(BC, HW, HoWo, in_bytes, in_bytes)
    else:
        tc = int(block_c)
        if BC % tc != 0 or (tc != BC and tc % 8 != 0):
            raise ValueError(
                f"block_c={tc} must divide B*C={BC} and be a multiple of 8 (or equal B*C)")
    assert BC % tc == 0

    p_arr = jnp.asarray(p, jnp.float32).reshape((1,))
    x2 = x.reshape(BC, HW)             # metadata-only reshape, no HBM traffic

    cost = pl.CostEstimate(
        flops=int(2 * BC * HW * HoWo + 6 * BC * HW),
        transcendentals=int(2 * BC * (HW + HoWo)),
        bytes_accessed=int(BC * HW * in_bytes + BC * HoWo * in_bytes + HW * HoWo * 2),
    )

    out2 = pl.pallas_call(
        functools.partial(_gem_spatial_kernel, eps=float(eps)),
        grid=(BC // tc,),
        in_specs=[
            pl.BlockSpec(memory_space=pltpu.MemorySpace.SMEM),     # p (scalar)
            pl.BlockSpec((tc, HW), lambda i: (i, 0)),              # activation tile (lane-dense)
            pl.BlockSpec((HW, HoWo), lambda i: (0, 0)),            # pooling selector (constant)
        ],
        out_specs=pl.BlockSpec((tc, HoWo), lambda i: (i, 0)),
        out_shape=jax.ShapeDtypeStruct((BC, HoWo), x.dtype),
        compiler_params=pltpu.CompilerParams(
            dimension_semantics=("parallel",),
            vmem_limit_bytes=32 * 2**20),
        cost_estimate=cost,
    )(p_arr, x2, m)
    return out2.reshape(B, C, Ho, Wo)


# ----------------------------------------------------------------------------
# Pure-JAX reference (mirrors F.avg_pool2d((2,2), stride=2, padding=1,
# count_include_pad=True) semantics).
# ----------------------------------------------------------------------------
def ref_gem_spatial(x, p, eps=1e-6):
    v = jnp.power(jnp.maximum(x.astype(jnp.float32), eps), p)
    s = jax.lax.reduce_window(
        v, 0.0, jax.lax.add,
        window_dimensions=(1, 1, 2, 2),
        window_strides=(1, 1, 2, 2),
        padding=((0, 0), (0, 0), (1, 1), (1, 1)))
    return jnp.power(s / 4.0, 1.0 / p)


if __name__ == "__main__":
    key = jax.random.PRNGKey(0)
    B, C, H, W = 2, 8, 16, 16
    x = jax.random.normal(key, (B, C, H, W), jnp.float32)
    p = jnp.ones((1,), jnp.float32) * 3.0            # nn.Parameter(torch.ones(1) * 3)

    fwd = jax.jit(gem_spatial)
    out = jax.block_until_ready(fwd(x, p))

    ref = ref_gem_spatial(x, p[0])
    assert out.shape == (B, C, H // 2 + 1, W // 2 + 1)
    assert out.dtype == x.dtype
    assert bool(jnp.allclose(out, ref, rtol=2e-2, atol=1e-4)), float(
        jnp.max(jnp.abs(out - ref)))

    # Second, smaller/odd shape: exercises odd spatial dims and the tc == B*C fallback.
    x_b = jax.random.normal(jax.random.PRNGKey(1), (1, 4, 15, 15), jnp.float32)
    out_b = jax.block_until_ready(jax.jit(gem_spatial)(x_b, p))
    ref_b = ref_gem_spatial(x_b, p[0])
    assert out_b.shape == (1, 4, 8, 8)
    assert bool(jnp.allclose(out_b, ref_b, rtol=2e-2, atol=1e-4)), float(
        jnp.max(jnp.abs(out_b - ref_b)))

    print("KERNEL_OK")
</pallas_src>

<mosaic_0001>
module attributes {stable_mosaic.version = 11 : i64} {
  func.func @_gem_spatial_kernel(%arg0: i32, %arg1: memref<1xf32, #tpu.memory_space<smem>>, %arg2: memref<8x256xf32, #tpu.memory_space<vmem>>, %arg3: memref<256x81xbf16, #tpu.memory_space<vmem>>, %arg4: memref<8x81xf32, #tpu.memory_space<vmem>>) attributes {dimension_semantics = [#tpu.dimension_semantics<parallel>], iteration_bounds = array<i64: 2>, scalar_prefetch = 0 : i64, scratch_operands = 0 : i64, tpu.core_type = #tpu.core_type<tc>, window_params = [{transform_indices = @transform_0, window_bounds = array<i64: 1>}, {transform_indices = @transform_1, window_bounds = array<i64: 8, 256>}, {pipeline_mode = #tpu.pipeline_mode<synchronous>, transform_indices = @transform_2, window_bounds = array<i64: 256, 81>}, {transform_indices = @transform_3, window_bounds = array<i64: 8, 81>}]} {
    %c0 = arith.constant 0 : index
    %0 = memref.load %arg1[%c0] : memref<1xf32, #tpu.memory_space<smem>>
    %cst = arith.constant 1.000000e+00 : f32
    %1 = arith.divf %cst, %0 : f32
    %c0_0 = arith.constant 0 : index
    %c0_1 = arith.constant 0 : index
    %2 = vector.load %arg2[%c0_0, %c0_1] : memref<8x256xf32, #tpu.memory_space<vmem>>, vector<8x256xf32>
    %cst_2 = arith.constant 9.99999997E-7 : f32
    %3 = vector.broadcast %cst_2 : f32 to vector<8x256xf32>
    %4 = arith.maximumf %2, %3 : vector<8x256xf32>
    %5 = math.log %4 : vector<8x256xf32>
    %6 = vector.broadcast %0 : f32 to vector<8x256xf32>
    %7 = arith.mulf %5, %6 : vector<8x256xf32>
    %8 = math.exp %7 : vector<8x256xf32>
    %9 = arith.truncf %8 : vector<8x256xf32> to vector<8x256xbf16>
    %c0_3 = arith.constant 0 : index
    %c0_4 = arith.constant 0 : index
    %10 = vector.load %arg3[%c0_3, %c0_4] : memref<256x81xbf16, #tpu.memory_space<vmem>>, vector<256x81xbf16>
    %cst_5 = arith.constant dense<0.000000e+00> : vector<8x81xf32>
    %11 = tpu.matmul %9, %10, %cst_5 {dimension_numbers = #tpu.dot_dimension_numbers<[1], [0], [0], [1], [0, 0, 1, 1], [], []>} : vector<8x256xbf16>, vector<256x81xbf16>, vector<8x81xf32> -> vector<8x81xf32>
    %12 = math.log %11 : vector<8x81xf32>
    %13 = vector.broadcast %1 : f32 to vector<8x81xf32>
    %14 = arith.mulf %12, %13 : vector<8x81xf32>
    %15 = math.exp %14 : vector<8x81xf32>
    %c0_6 = arith.constant 0 : index
    %c0_7 = arith.constant 0 : index
    %16 = vector.load %arg4[%c0_6, %c0_7] : memref<8x81xf32, #tpu.memory_space<vmem>>, vector<8x81xf32>
    tpu.vector_store %arg4[%c0_6, %c0_7], %15 {strides = array<i32>} : memref<8x81xf32, #tpu.memory_space<vmem>>, vector<8x81xf32>,
    return
  }
  func.func @transform_0(%arg0: i32) -> i32 {
    %c0_i32 = arith.constant 0 : i32
    %c0_i32_0 = arith.constant 0 : i32
    return %c0_i32 : i32
  }
  func.func @transform_1(%arg0: i32) -> (i32, i32) {
    %c0_i32 = arith.constant 0 : i32
    %c0_i32_0 = arith.constant 0 : i32
    return %arg0, %c0_i32 : i32, i32
  }
  func.func @transform_2(%arg0: i32) -> (i32, i32) {
    %c0_i32 = arith.constant 0 : i32
    %c0_i32_0 = arith.constant 0 : i32
    %c0_i32_1 = arith.constant 0 : i32
    return %c0_i32, %c0_i32_0 : i32, i32
  }
  func.func @transform_3(%arg0: i32) -> (i32, i32) {
    %c0_i32 = arith.constant 0 : i32
    %c0_i32_0 = arith.constant 0 : i32
    return %arg0, %c0_i32 : i32, i32
  }
}

</mosaic_0001>

<bundles_post_ra>
// kernel: gem_spatial.1
= control target key start
LH: loop header
LB: loop body
LE: loop exit
PB: predicated region body
PF: predicated region fallthrough
CT: control target
= control target key end

     0   :  { %s541_s14 = smov 0   ;;  %s610_s0 = inlined_call_operand.<no memory space> [shape: f32[1], index: 0, kind: input, shape index: {}]   ;;  %s611_s1 = inlined_call_operand.vmem [shape: f32[16,256], index: 1, kind: input, shape index: {}]   ;;  %s612_s2 = inlined_call_operand.vmem [shape: bf16[256,81], index: 2, kind: input, shape index: {}]   ;;  %s613_s3 = inlined_call_operand.vmem [shape: f32[16,81], index: 3, kind: output, shape index: {}]  }
   0x1   :  { %8 = sst [smem:[#allocation2]] %s610_s0 }
   0x2 LB: > { %s421_s15 = sadd.s32 4294967295, %s516_s14   ;;  %p425_p0 = scmp.ge.s32.totalorder %s516_s14, 1  ;;  %s516_s14 = sphi %s541_s14, %s14_s14  }
   0x3   : > { %p138_p1 = scmp.lt.s32.totalorder %s516_s14, 3 }
   0x5   : > { %p139_p2 = pnand %p425_p0, %p138_p1 }
   0x6   : > { %v480_v0 = vld [vmem:[%s612_s2 + $0x40] sm:$0xff] (!%p139_p2)   ;;  %v482_v2 = vld [vmem:[%s612_s2 + $0x48] sm:$0xff] (!%p139_p2)   ;;  %p161_p3 = scmp.lt.s32.totalorder (!%p139_p2), %s421_s15, 1  ;;  %v484_v4 = vld [vmem:[%s612_s2 + $0x50] sm:$0xff] (!%p139_p2)   ;;  %s171_s16 = sld [smem:[#allocation2]] (!%p139_p2)  ;;  %vm366_vm0 = vcmask (!%p139_p2), 662528  }
   0x7   : > { %142 = sbr.rel (%p139_p2) target bundleno = 296 (0x128), region = 32  ;;  %v481_v1 = vld [vmem:[%s612_s2] sm:$0xff] (!%p139_p2)   ;;  %448 = vmatprep.subr.bf16.mxu0 (!%p139_p2), %v480_v0  ;;  %v483_v3 = vld [vmem:[%s612_s2 + $0x8] sm:$0xff] (!%p139_p2)   ;;  %v485_v5 = vld [vmem:[%s612_s2 + $0x10] sm:$0xff] (!%p139_p2)  }
   0x8   : > { %449 = vmatpush3.bf16.msra.mxu0 (!%p139_p2), %v481_v1  ;;  %v486_v6 = vld [vmem:[%s612_s2 + $0x58] sm:$0xff] (!%p139_p2)   ;;  %v488_v8 = vld [vmem:[%s612_s2 + $0x60] sm:$0xff] (!%p139_p2)   ;;  %v490_v10 = vld [vmem:[%s612_s2 + $0x68] sm:$0xff] (!%p139_p2)  }
   0x9   : > { %450 = vmatprep.subr.bf16.mxu0 (!%p139_p2), %v482_v2  ;;  %v487_v7 = vld [vmem:[%s612_s2 + $0x18] sm:$0xff] (!%p139_p2)   ;;  %v489_v9 = vld [vmem:[%s612_s2 + $0x20] sm:$0xff] (!%p139_p2)   ;;  %v491_v15 = vld [vmem:[%s612_s2 + $0x28] sm:$0xff] (!%p139_p2)  }
   0xa   : > { %v492_v16 = vld [vmem:[%s612_s2 + $0x70] sm:$0xff] (!%p139_p2)   ;;  %v494_v19 = vld [vmem:[%s612_s2 + $0x78] sm:$0xff] (!%p139_p2)  }
   0xb   : > { %v493_v18 = vld [vmem:[%s612_s2 + $0x30] sm:$0xff] (!%p139_p2)   ;;  %v495_v20 = vld [vmem:[%s612_s2 + $0x38] sm:$0xff] (!%p139_p2)  }
   0xc   : > { %451 = vmatpush3.bf16.msra.mxu0 (!%p139_p2), %v483_v3  ;;  %v172_v17 = vstv (!%p139_p2), %s171_s16 }
   0xd   : > { %452 = vmatprep.subr.bf16.mxu0 (!%p139_p2), %v484_v4 }
   0xe   : > { %s615_s15 = smov (!%p161_p3, %s421_s15), 1 }
   0xf   : > { %s447_s29 = sshll.u32 %s615_s15, 4  ;;  %s428_s27 = sshll.u32 %s615_s15, 3 }
  0x10   : > { %453 = vmatpush3.bf16.msra.mxu0 %v485_v5  ;;  %s165_s9 = scalar_lea.vmem %s611_s1, %s447_s29  ;;  %s169_s30 = scalar_lea.vmem %s613_s3, %s428_s27 }
  0x11   : > { %454 = vmatprep.subr.bf16.mxu0 %v486_v6  ;;  %v175_v11 = vld [vmem:[%s165_s9] sm:$0xff]  ;;  %v176_v12 = vld [vmem:[%s165_s9 + $0x8] sm:$0xff] }
  0x12   : > { %v177_v13 = vmax.f32 %v175_v11, 1e-06  ;;  %v178_v14 = vmax.f32 %v176_v12, 1e-06 }
  0x14   : > { %455 = vmatpush3.bf16.msra.mxu0 %v487_v7  ;;  %496 = vlog2.f32 %v177_v13 }
  0x15   : > { %456 = vmatprep.subr.bf16.mxu0 %v488_v8  ;;  %498 = vlog2.f32 %v178_v14 }
  0x16   : > { %500 = vrcp.f32 %v172_v17 }
  0x18   : > { %457 = vmatpush3.bf16.msra.mxu0 %v489_v9 }
  0x19   : > { %458 = vmatprep.subr.bf16.mxu0 %v490_v10 }
  0x1c   : > { %459 = vmatpush3.bf16.msra.mxu0 %v491_v15 }
  0x1d   : > { %460 = vmatprep.subr.bf16.mxu0 %v492_v16 }
  0x1e   : > { %v497_v21 = vpop.eup %496 }
  0x1f   : > { %v499_v22 = vpop.eup %498  ;;  %v180_v23 = vmul.f32 0.6931472, %v497_v21 }
  0x20   : > { %461 = vmatpush3.bf16.msra.mxu0 %v493_v18  ;;  %v182_v24 = vmul.f32 0.6931472, %v499_v22  ;;  %v501_v26 = vpop.eup %500 }
  0x21   : > { %462 = vmatprep.subr.bf16.mxu0 %v494_v19  ;;  %v184_v25 = vmul.f32 %v180_v23, %v172_v17  ;;  %470 = vpush %v501_v26 }
  0x22   : > { %v185_v27 = vmul.f32 %v182_v24, %v172_v17 }
  0x23   : > { %v186_v28 = vmul.f32 1.442695, %v184_v25 }
  0x24   : > { %463 = vmatpush3.bf16.msra.mxu0 %v495_v20  ;;  %v188_v29 = vmul.f32 1.442695, %v185_v27 }
  0x25   : > { %502 = vpow2.f32 %v186_v28 }
  0x26   : > { %504 = vpow2.f32 %v188_v29 }
  0x2f   : > { %v503_v30 = vpop.eup %502 }
  0x30   : > { %v505_v31 = vpop.eup %504  ;;  %v190_v32 = vpack.c.bf16 %v503_v30, %v503_v30 }
  0x31   : > { %v191_v33 = vpack.c.bf16 %v505_v31, %v505_v31 }
  0x33   : > { %352 = vmatprep.mubr.bf16.mxu0 %v191_v33 }
  0x34   : > { %353 = vmatmul.mubr.bf16.vlgmr.msra.gmra.mrb[0].mxu0 %v190_v32 }
  0x52   : > { %s471_s26 = spop %470 }
  0x53   : > { %v362_v40 = vstv %s471_s26 }
 0x107   : > { %v464_v34 = vpop.f32.mrb[0].mxu0 }
 0x108   : > { %v465_v35 = vpop.f32.mrb[1].mxu0 }
 0x109   : > { %v466_v36 = vadd.f32 %v465_v35, %v464_v34  ;;  %v467_v37 = vpop.f32.mrb[2].mxu0 }
 0x10a   : > { %v468_v38 = vpop.f32.mrb[3].mxu0 }
 0x10b   : > { %506 = vlog2.f32 %v466_v36 }
 0x115   : > { %v507_v39 = vpop.eup %506 }
 0x116   : > { %v361_v41 = vmul.f32 0.6931472, %v507_v39 }
 0x118   : > { %v363_v42 = vmul.f32 %v362_v40, %v361_v41 }
 0x11a   : > { %v364_v43 = vmul.f32 1.442695, %v363_v42 }
 0x11c   : > { %508 = vpow2.f32 %v364_v43 }
 0x126   : > { %v509_v44 = vpop.eup %508 }
 0x127   : > { %367 = vst.msk [vmem:[%s169_s30] sm:$0xff] %vm366_vm0, %v509_v44 }
 0x128 PF: > { %s14_s14 = sadd.s32 1, %s516_s14  }
 0x129   : > { %p11_p4 = scmp.ge.s32.totalorder %s14_s14, 4  }
 0x12b   :  { %13 = sbr.rel (!%p11_p4) target bundleno = 2 (0x2), region = 62 }

</bundles_post_ra>
